<compile_context>
chip_gen: v6e
topology: v6e:2x2x1
jax: 0.10.0
libtpu: 0.0.40
codegen_flags: <defaults>
</compile_context>

<pallas_src>
import math
from functools import partial

import jax
import jax.numpy as jnp
from jax import lax
from jax.experimental import pallas as pl
from jax.experimental.pallas import tpu as pltpu

STAGE_NUM = 3
BN_EPS = 1e-5


# --------------------------------------------------------------------------
# Pass 1: conv1 -> 3-stage EM attention -> BN partial stats (per batch)
# --------------------------------------------------------------------------
def cae_em_kernel(x_ref, w1_ref, b1_ref, w2_ref, mu0t_ref,
                  mu_ref, zt_ref, stats_ref, *, compute_dtype):
    def mm(a, b):
        return jnp.dot(a, b, preferred_element_type=jnp.float32)

    # conv1: 1x1 conv with bias == (Cp,Cp) @ (Cp,N) + b   (f32 accumulation)
    xi = mm(w1_ref[...], x_ref[...]) + b1_ref[...]          # (Cp, N) f32
    xi_mm = xi.astype(compute_dtype)                        # cast once (not per mm)
    # One transposed copy per batch (f32 transpose, then kept in compute dtype)
    # so every EM matmul below is canonical last-of-LHS x first-of-RHS.
    xi_t = xi.T.astype(compute_dtype)                       # (N, Cp)

    mu_t = mu0t_ref[...]                                    # (K, Cp), mu carried transposed
    zt = None
    for _ in range(STAGE_NUM):
        # z^T = mu^T @ x -> (K, N)
        zt = mm(mu_t.astype(compute_dtype), xi_mm)
        # softmax over K (sublane axis 0)  == torch softmax(z, dim=2)
        zt = jnp.exp(zt - jnp.max(zt, axis=0, keepdims=True))
        zt = zt * pl.reciprocal(jnp.sum(zt, axis=0, keepdims=True), approx=True)
        # z_ = z / (1e-6 + z.sum over N)
        z_n = zt * pl.reciprocal(1e-6 + jnp.sum(zt, axis=1, keepdims=True),
                                 approx=True)
        # mu^T = z_^T @ x^T -> (K, Cp)
        mu_t = mm(z_n.astype(compute_dtype), xi_t)
        # l2 norm over channels (tiny; exact divide)
        nrm = jnp.sqrt(jnp.sum(mu_t * mu_t, axis=1, keepdims=True))
        mu_t = mu_t / (1e-6 + nrm)

    mu = mu_t.T                                             # (Cp, K) f32, tiny transpose
    mu_ref[...] = mu
    zt_ref[...] = zt

    # Per-batch, per-channel BatchNorm partials over x2 = conv2(relu(mu @ z^T)).
    # x2 itself is NOT written to HBM; pass 2 recomputes it per tile.
    xr = jnp.maximum(mm(mu.astype(compute_dtype), zt.astype(compute_dtype)), 0.0)
    x2 = mm(w2_ref[...], xr.astype(compute_dtype))          # (C, N) f32 (unpadded rows)
    stats_ref[:, 0:1] = jnp.sum(x2, axis=1, keepdims=True)        # channel sum
    stats_ref[:, 1:2] = jnp.sum(x2 * x2, axis=1, keepdims=True)   # channel sum of squares


# --------------------------------------------------------------------------
# Pass 2: recompute conv2(relu(mu @ z^T)) per (batch, N tile), then
#         folded BatchNorm (one FMA) + residual + ReLU -> unpadded output.
# --------------------------------------------------------------------------
def cae_bn_kernel(mu_ref, zt_ref, w2_ref, scale_ref, shift_ref, xres_ref,
                  out_ref, *, compute_dtype):
    mu = mu_ref[...].astype(compute_dtype)                  # (Cp, K)
    zt = zt_ref[...].astype(compute_dtype)                  # (K, tn)
    xr = jnp.maximum(jnp.dot(mu, zt, preferred_element_type=jnp.float32), 0.0)
    x2 = jnp.dot(w2_ref[...], xr.astype(compute_dtype),
                 preferred_element_type=jnp.float32)        # (C, tn)
    out_ref[...] = jnp.maximum(
        x2 * scale_ref[...] + shift_ref[...] + xres_ref[...], 0.0)


# --------------------------------------------------------------------------
# Wrapper
# --------------------------------------------------------------------------
def _round_up(v, m):
    return (v + m - 1) // m * m


def _pad_to(a, axis, target):
    pad = target - a.shape[axis]
    if pad == 0:
        return a
    widths = [(0, 0)] * a.ndim
    widths[axis] = (0, pad)
    return jnp.pad(a, widths)


def _pick_col_tile(n, max_t=2048):
    """Largest lane-aligned tile (<= max_t) that divides n; else the full n."""
    if n <= max_t:
        return n
    t = (max_t // 128) * 128
    while t >= 128:
        if n % t == 0:
            return t
        t -= 128
    return n


def cae_forward(x_nchw, params, use_bf16=True):
    b, c, h, w = x_nchw.shape
    n = h * w
    k = params["mu"].shape[-1]
    f32 = jnp.float32
    compute_dtype = jnp.bfloat16 if use_bf16 else jnp.float32
    # Pad channels only to the sublane granule (not 128): cheap, layout-friendly.
    cp = _round_up(c, 16 if use_bf16 else 8)

    x_res = x_nchw.reshape(b, c, n).astype(f32)                       # residual (unpadded)
    x_p = _pad_to(x_res, 1, cp).astype(compute_dtype)                 # (B, Cp, N)
    w1 = _pad_to(_pad_to(params["w1"].astype(f32), 0, cp), 1, cp
                 ).astype(compute_dtype)                              # (Cp, Cp)
    b1 = _pad_to(params["b1"].astype(f32), 0, cp)                     # (Cp, 1) f32
    w2c = _pad_to(params["w2"].astype(f32), 1, cp).astype(compute_dtype)  # (C, Cp)
    mu0t = _pad_to(jnp.swapaxes(params["mu"][0].astype(f32), 0, 1), 1, cp
                   ).astype(compute_dtype)                            # (K, Cp)
    gamma = params["gamma"].astype(f32)                               # (C, 1)
    beta = params["beta"].astype(f32)                                 # (C, 1)

    def batch_blk(rows, cols):
        return pl.BlockSpec((pl.Squeezed(), rows, cols), lambda i: (i, 0, 0))

    # ---- pass 1: per-batch EM + BN partials -------------------------------
    mu_p, zt, stats = pl.pallas_call(
        partial(cae_em_kernel, compute_dtype=compute_dtype),
        out_shape=(
            jax.ShapeDtypeStruct((b, cp, k), f32),    # mu (padded channel rows = 0)
            jax.ShapeDtypeStruct((b, k, n), f32),     # z^T
            jax.ShapeDtypeStruct((b, c, 2), f32),     # packed (sum, sumsq) per channel
        ),
        grid_spec=pltpu.PrefetchScalarGridSpec(
            num_scalar_prefetch=0,
            grid=(b,),
            in_specs=[
                batch_blk(cp, n),                               # x (compute dtype)
                pl.BlockSpec((cp, cp), lambda i: (0, 0)),       # w1 (resident)
                pl.BlockSpec((cp, 1), lambda i: (0, 0)),        # b1
                pl.BlockSpec((c, cp), lambda i: (0, 0)),        # w2 (only C out rows)
                pl.BlockSpec((k, cp), lambda i: (0, 0)),        # mu0^T
            ],
            out_specs=(
                batch_blk(cp, k),
                batch_blk(k, n),
                batch_blk(c, 2),
            ),
        ),
        compiler_params=pltpu.CompilerParams(
            dimension_semantics=("parallel",)),
    )(x_p, w1, b1, w2c, mu0t)

    # Cross-batch BatchNorm statistics (only cross-batch coupling), folded
    # into one scale/shift FMA for pass 2.
    denom = float(b * n)
    ssum = jnp.sum(stats, axis=0)                              # (C, 2)
    mean = ssum[:, 0:1] / denom                                # (C, 1)
    var = jnp.maximum(ssum[:, 1:2] / denom - mean * mean, 0.0)
    scale = lax.rsqrt(var + BN_EPS) * gamma                    # (C, 1)
    shift = beta - mean * scale                                # (C, 1)

    # ---- pass 2: recompute conv2 path per (batch, N tile) + fused BN/res/relu
    tn = _pick_col_tile(n)
    nt = n // tn

    def tile_blk(rows):
        return pl.BlockSpec((pl.Squeezed(), rows, tn), lambda i, j: (i, 0, j))

    out = pl.pallas_call(
        partial(cae_bn_kernel, compute_dtype=compute_dtype),
        out_shape=jax.ShapeDtypeStruct((b, c, n), f32),        # unpadded output
        grid_spec=pltpu.PrefetchScalarGridSpec(
            num_scalar_prefetch=0,
            grid=(b, nt),
            in_specs=[
                pl.BlockSpec((pl.Squeezed(), cp, k), lambda i, j: (i, 0, 0)),  # mu
                pl.BlockSpec((pl.Squeezed(), k, tn), lambda i, j: (i, 0, j)),  # z^T tile
                pl.BlockSpec((c, cp), lambda i, j: (0, 0)),                    # w2
                pl.BlockSpec((c, 1), lambda i, j: (0, 0)),                     # scale
                pl.BlockSpec((c, 1), lambda i, j: (0, 0)),                     # shift
                tile_blk(c),                                                   # residual
            ],
            out_specs=tile_blk(c),
        ),
        compiler_params=pltpu.CompilerParams(
            dimension_semantics=("parallel", "parallel")),
    )(mu_p, zt, w2c, scale, shift, x_res)

    return (out.reshape(b, c, h, w),
            mu_p[:, :c],                       # tiny slice (B, C, K)
            zt.reshape(b, k, h, w))


# --------------------------------------------------------------------------
# Pure-JAX reference (mirror of the PyTorch forward) for validation
# --------------------------------------------------------------------------
def cae_reference(x_nchw, params):
    hp = lax.Precision.HIGHEST
    b, c, h, w = x_nchw.shape
    n = h * w
    k = params["mu"].shape[-1]
    x = x_nchw.reshape(b, c, n)
    idn = x
    x = jnp.einsum('oc,bcn->bon', params["w1"], x, precision=hp) \
        + params["b1"][None]
    mu = jnp.broadcast_to(params["mu"], (b, c, k))
    z = None
    for _ in range(STAGE_NUM):
        z = jnp.einsum('bcn,bck->bnk', x, mu, precision=hp)
        z = jax.nn.softmax(z, axis=2)
        z_ = z / (1e-6 + jnp.sum(z, axis=1, keepdims=True))
        mu = jnp.einsum('bcn,bnk->bck', x, z_, precision=hp)
        mu = mu / (1e-6 + jnp.linalg.norm(mu, axis=1, keepdims=True))
    zt = jnp.swapaxes(z, 1, 2)
    xr = jnp.maximum(jnp.einsum('bck,bkn->bcn', mu, zt, precision=hp), 0.0)
    x2 = jnp.einsum('oc,bcn->bon', params["w2"], xr, precision=hp)
    mean = jnp.mean(x2, axis=(0, 2), keepdims=True)
    var = jnp.mean((x2 - mean) ** 2, axis=(0, 2), keepdims=True)
    xn = (x2 - mean) / jnp.sqrt(var + BN_EPS) * params["gamma"][None] \
        + params["beta"][None]
    out = jnp.maximum(xn + idn, 0.0)
    return out.reshape(b, c, h, w), mu, zt.reshape(b, k, h, w)


if __name__ == "__main__":
    B, C, H, W, K = 2, 4, 16, 16, 8
    key = jax.random.PRNGKey(0)
    k_mu, k_w1, k_b1, k_w2, k_x = jax.random.split(key, 5)

    # deterministic synthetic parameters (shapes from CAE.__init__)
    mu = jax.random.normal(k_mu, (1, C, K), jnp.float32) * math.sqrt(2.0 / K)
    mu = mu / (1e-6 + jnp.sqrt(jnp.sum(mu * mu, axis=1, keepdims=True)))
    w1 = jax.random.normal(k_w1, (C, C), jnp.float32) * math.sqrt(2.0 / C)
    b1 = jax.random.normal(k_b1, (C, 1), jnp.float32) * 0.1
    w2 = jax.random.normal(k_w2, (C, C), jnp.float32) * math.sqrt(2.0 / C)
    gamma = jnp.ones((C, 1), jnp.float32)   # BN weight = 1
    beta = jnp.zeros((C, 1), jnp.float32)   # BN bias = 0
    params = dict(mu=mu, w1=w1, b1=b1, w2=w2, gamma=gamma, beta=beta)

    x = jax.random.normal(k_x, (B, C, H, W), jnp.float32)

    ref_out, ref_mu, ref_zt = cae_reference(x, params)

    # Strict numerical-parity check on the f32-MXU path.
    out32, mu32, zt32 = jax.block_until_ready(
        jax.jit(partial(cae_forward, use_bf16=False))(x, params))
    assert jnp.allclose(out32, ref_out, atol=1e-2, rtol=1e-2)
    assert jnp.allclose(mu32, ref_mu, atol=1e-2, rtol=1e-2)
    assert jnp.allclose(zt32, ref_zt, atol=1e-2, rtol=1e-2)

    # Default fast path: bf16 MXU operands (f32 accumulation / elementwise).
    # Loose sanity tolerance: 3 EM stages amplify bf16 rounding; strict parity
    # is established above on the f32 path.
    out, mu_out, zt_out = jax.block_until_ready(jax.jit(cae_forward)(x, params))
    assert jnp.allclose(out, ref_out, atol=1e-1, rtol=1e-1)
    assert jnp.allclose(mu_out, ref_mu, atol=1e-1, rtol=1e-1)
    assert jnp.allclose(zt_out, ref_zt, atol=1e-1, rtol=1e-1)
    print("KERNEL_OK")
</pallas_src>

<mosaic_0001>
module attributes {stable_mosaic.version = 11 : i64} {
  func.func @cae_em_kernel(%arg0: i32, %arg1: memref<1x8x256xf32, #tpu.memory_space<vmem>>, %arg2: memref<8x8xf32, #tpu.memory_space<vmem>>, %arg3: memref<8x1xf32, #tpu.memory_space<vmem>>, %arg4: memref<4x8xf32, #tpu.memory_space<vmem>>, %arg5: memref<8x8xf32, #tpu.memory_space<vmem>>, %arg6: memref<1x8x8xf32, #tpu.memory_space<vmem>>, %arg7: memref<1x8x256xf32, #tpu.memory_space<vmem>>, %arg8: memref<1x4x2xf32, #tpu.memory_space<vmem>>) attributes {dimension_semantics = [#tpu.dimension_semantics<parallel>], iteration_bounds = array<i64: 2>, scalar_prefetch = 0 : i64, scratch_operands = 0 : i64, tpu.core_type = #tpu.core_type<tc>, window_params = [{transform_indices = @transform_0, window_bounds = array<i64: 1, 8, 256>}, {pipeline_mode = #tpu.pipeline_mode<synchronous>, transform_indices = @transform_1, window_bounds = array<i64: 8, 8>}, {pipeline_mode = #tpu.pipeline_mode<synchronous>, transform_indices = @transform_2, window_bounds = array<i64: 8, 1>}, {pipeline_mode = #tpu.pipeline_mode<synchronous>, transform_indices = @transform_3, window_bounds = array<i64: 4, 8>}, {pipeline_mode = #tpu.pipeline_mode<synchronous>, transform_indices = @transform_4, window_bounds = array<i64: 8, 8>}, {transform_indices = @transform_5, window_bounds = array<i64: 1, 8, 8>}, {transform_indices = @transform_6, window_bounds = array<i64: 1, 8, 256>}, {transform_indices = @transform_7, window_bounds = array<i64: 1, 4, 2>}]} {
    %c0 = arith.constant 0 : index
    %c0_0 = arith.constant 0 : index
    %0 = vector.load %arg2[%c0, %c0_0] : memref<8x8xf32, #tpu.memory_space<vmem>>, vector<8x8xf32>
    %c0_1 = arith.constant 0 : index
    %c0_2 = arith.constant 0 : index
    %c0_3 = arith.constant 0 : index
    %1 = vector.load %arg1[%c0_1, %c0_2, %c0_3] : memref<1x8x256xf32, #tpu.memory_space<vmem>>, vector<1x8x256xf32>
    %2 = vector.shape_cast %1 : vector<1x8x256xf32> to vector<8x256xf32>
    %cst = arith.constant dense<0.000000e+00> : vector<8x256xf32>
    %3 = tpu.matmul %0, %2, %cst {dimension_numbers = #tpu.dot_dimension_numbers<[1], [0], [0], [1], [0, 0, 1, 1], [], []>} : vector<8x8xf32>, vector<8x256xf32>, vector<8x256xf32> -> vector<8x256xf32>
    %c0_4 = arith.constant 0 : index
    %c0_5 = arith.constant 0 : index
    %4 = vector.load %arg3[%c0_4, %c0_5] : memref<8x1xf32, #tpu.memory_space<vmem>>, vector<8x1xf32>
    %5 = vector.broadcast %4 : vector<8x1xf32> to vector<8x256xf32>
    %6 = arith.addf %3, %5 : vector<8x256xf32>
    %7 = tpu.transpose %6, [1, 0] : vector<8x256xf32> -> vector<256x8xf32>
    %c0_6 = arith.constant 0 : index
    %c0_7 = arith.constant 0 : index
    %8 = vector.load %arg5[%c0_6, %c0_7] : memref<8x8xf32, #tpu.memory_space<vmem>>, vector<8x8xf32>
    %cst_8 = arith.constant dense<0.000000e+00> : vector<8x256xf32>
    %9 = tpu.matmul %8, %6, %cst_8 {dimension_numbers = #tpu.dot_dimension_numbers<[1], [0], [0], [1], [0, 0, 1, 1], [], []>} : vector<8x8xf32>, vector<8x256xf32>, vector<8x256xf32> -> vector<8x256xf32>
    %cst_9 = arith.constant dense<0xFF800000> : vector<256xf32>
    %10 = vector.multi_reduction <maximumf>, %9, %cst_9 [0] : vector<8x256xf32> to vector<256xf32>
    %11 = vector.shape_cast %10 : vector<256xf32> to vector<1x256xf32>
    %12 = vector.broadcast %11 : vector<1x256xf32> to vector<8x256xf32>
    %13 = arith.subf %9, %12 : vector<8x256xf32>
    %14 = math.exp %13 : vector<8x256xf32>
    %cst_10 = arith.constant dense<0.000000e+00> : vector<256xf32>
    %15 = vector.multi_reduction <add>, %14, %cst_10 [0] : vector<8x256xf32> to vector<256xf32>
    %16 = vector.shape_cast %15 : vector<256xf32> to vector<1x256xf32>
    %17 = tpu.reciprocal %16 {approx = true} : vector<1x256xf32> -> vector<1x256xf32>
    %18 = vector.broadcast %17 : vector<1x256xf32> to vector<8x256xf32>
    %19 = arith.mulf %14, %18 : vector<8x256xf32>
    %cst_11 = arith.constant dense<0.000000e+00> : vector<8xf32>
    %20 = vector.multi_reduction <add>, %19, %cst_11 [1] : vector<8x256xf32> to vector<8xf32>
    %21 = vector.shape_cast %20 : vector<8xf32> to vector<8x1xf32>
    %cst_12 = arith.constant 9.99999997E-7 : f32
    %22 = vector.broadcast %cst_12 : f32 to vector<8x1xf32>
    %23 = arith.addf %22, %21 : vector<8x1xf32>
    %24 = tpu.reciprocal %23 {approx = true} : vector<8x1xf32> -> vector<8x1xf32>
    %25 = vector.broadcast %24 : vector<8x1xf32> to vector<8x256xf32>
    %26 = arith.mulf %19, %25 : vector<8x256xf32>
    %cst_13 = arith.constant dense<0.000000e+00> : vector<8x8xf32>
    %27 = tpu.matmul %26, %7, %cst_13 {dimension_numbers = #tpu.dot_dimension_numbers<[1], [0], [0], [1], [0, 0, 1, 1], [], []>} : vector<8x256xf32>, vector<256x8xf32>, vector<8x8xf32> -> vector<8x8xf32>
    %28 = arith.mulf %27, %27 : vector<8x8xf32>
    %cst_14 = arith.constant dense<0.000000e+00> : vector<8xf32>
    %29 = vector.multi_reduction <add>, %28, %cst_14 [1] : vector<8x8xf32> to vector<8xf32>
    %30 = vector.shape_cast %29 : vector<8xf32> to vector<8x1xf32>
    %31 = math.sqrt %30 : vector<8x1xf32>
    %cst_15 = arith.constant 9.99999997E-7 : f32
    %32 = vector.broadcast %cst_15 : f32 to vector<8x1xf32>
    %33 = arith.addf %32, %31 : vector<8x1xf32>
    %34 = vector.broadcast %33 : vector<8x1xf32> to vector<8x8xf32>
    %35 = arith.divf %27, %34 : vector<8x8xf32>
    %cst_16 = arith.constant dense<0.000000e+00> : vector<8x256xf32>
    %36 = tpu.matmul %35, %6, %cst_16 {dimension_numbers = #tpu.dot_dimension_numbers<[1], [0], [0], [1], [0, 0, 1, 1], [], []>} : vector<8x8xf32>, vector<8x256xf32>, vector<8x256xf32> -> vector<8x256xf32>
    %cst_17 = arith.constant dense<0xFF800000> : vector<256xf32>
    %37 = vector.multi_reduction <maximumf>, %36, %cst_17 [0] : vector<8x256xf32> to vector<256xf32>
    %38 = vector.shape_cast %37 : vector<256xf32> to vector<1x256xf32>
    %39 = vector.broadcast %38 : vector<1x256xf32> to vector<8x256xf32>
    %40 = arith.subf %36, %39 : vector<8x256xf32>
    %41 = math.exp %40 : vector<8x256xf32>
    %cst_18 = arith.constant dense<0.000000e+00> : vector<256xf32>
    %42 = vector.multi_reduction <add>, %41, %cst_18 [0] : vector<8x256xf32> to vector<256xf32>
    %43 = vector.shape_cast %42 : vector<256xf32> to vector<1x256xf32>
    %44 = tpu.reciprocal %43 {approx = true} : vector<1x256xf32> -> vector<1x256xf32>
    %45 = vector.broadcast %44 : vector<1x256xf32> to vector<8x256xf32>
    %46 = arith.mulf %41, %45 : vector<8x256xf32>
    %cst_19 = arith.constant dense<0.000000e+00> : vector<8xf32>
    %47 = vector.multi_reduction <add>, %46, %cst_19 [1] : vector<8x256xf32> to vector<8xf32>
    %48 = vector.shape_cast %47 : vector<8xf32> to vector<8x1xf32>
    %cst_20 = arith.constant 9.99999997E-7 : f32
    %49 = vector.broadcast %cst_20 : f32 to vector<8x1xf32>
    %50 = arith.addf %49, %48 : vector<8x1xf32>
    %51 = tpu.reciprocal %50 {approx = true} : vector<8x1xf32> -> vector<8x1xf32>
    %52 = vector.broadcast %51 : vector<8x1xf32> to vector<8x256xf32>
    %53 = arith.mulf %46, %52 : vector<8x256xf32>
    %cst_21 = arith.constant dense<0.000000e+00> : vector<8x8xf32>
    %54 = tpu.matmul %53, %7, %cst_21 {dimension_numbers = #tpu.dot_dimension_numbers<[1], [0], [0], [1], [0, 0, 1, 1], [], []>} : vector<8x256xf32>, vector<256x8xf32>, vector<8x8xf32> -> vector<8x8xf32>
    %55 = arith.mulf %54, %54 : vector<8x8xf32>
    %cst_22 = arith.constant dense<0.000000e+00> : vector<8xf32>
    %56 = vector.multi_reduction <add>, %55, %cst_22 [1] : vector<8x8xf32> to vector<8xf32>
    %57 = vector.shape_cast %56 : vector<8xf32> to vector<8x1xf32>
    %58 = math.sqrt %57 : vector<8x1xf32>
    %cst_23 = arith.constant 9.99999997E-7 : f32
    %59 = vector.broadcast %cst_23 : f32 to vector<8x1xf32>
    %60 = arith.addf %59, %58 : vector<8x1xf32>
    %61 = vector.broadcast %60 : vector<8x1xf32> to vector<8x8xf32>
    %62 = arith.divf %54, %61 : vector<8x8xf32>
    %cst_24 = arith.constant dense<0.000000e+00> : vector<8x256xf32>
    %63 = tpu.matmul %62, %6, %cst_24 {dimension_numbers = #tpu.dot_dimension_numbers<[1], [0], [0], [1], [0, 0, 1, 1], [], []>} : vector<8x8xf32>, vector<8x256xf32>, vector<8x256xf32> -> vector<8x256xf32>
    %cst_25 = arith.constant dense<0xFF800000> : vector<256xf32>
    %64 = vector.multi_reduction <maximumf>, %63, %cst_25 [0] : vector<8x256xf32> to vector<256xf32>
    %65 = vector.shape_cast %64 : vector<256xf32> to vector<1x256xf32>
    %66 = vector.broadcast %65 : vector<1x256xf32> to vector<8x256xf32>
    %67 = arith.subf %63, %66 : vector<8x256xf32>
    %68 = math.exp %67 : vector<8x256xf32>
    %cst_26 = arith.constant dense<0.000000e+00> : vector<256xf32>
    %69 = vector.multi_reduction <add>, %68, %cst_26 [0] : vector<8x256xf32> to vector<256xf32>
    %70 = vector.shape_cast %69 : vector<256xf32> to vector<1x256xf32>
    %71 = tpu.reciprocal %70 {approx = true} : vector<1x256xf32> -> vector<1x256xf32>
    %72 = vector.broadcast %71 : vector<1x256xf32> to vector<8x256xf32>
    %73 = arith.mulf %68, %72 : vector<8x256xf32>
    %cst_27 = arith.constant dense<0.000000e+00> : vector<8xf32>
    %74 = vector.multi_reduction <add>, %73, %cst_27 [1] : vector<8x256xf32> to vector<8xf32>
    %75 = vector.shape_cast %74 : vector<8xf32> to vector<8x1xf32>
    %cst_28 = arith.constant 9.99999997E-7 : f32
    %76 = vector.broadcast %cst_28 : f32 to vector<8x1xf32>
    %77 = arith.addf %76, %75 : vector<8x1xf32>
    %78 = tpu.reciprocal %77 {approx = true} : vector<8x1xf32> -> vector<8x1xf32>
    %79 = vector.broadcast %78 : vector<8x1xf32> to vector<8x256xf32>
    %80 = arith.mulf %73, %79 : vector<8x256xf32>
    %cst_29 = arith.constant dense<0.000000e+00> : vector<8x8xf32>
    %81 = tpu.matmul %80, %7, %cst_29 {dimension_numbers = #tpu.dot_dimension_numbers<[1], [0], [0], [1], [0, 0, 1, 1], [], []>} : vector<8x256xf32>, vector<256x8xf32>, vector<8x8xf32> -> vector<8x8xf32>
    %82 = arith.mulf %81, %81 : vector<8x8xf32>
    %cst_30 = arith.constant dense<0.000000e+00> : vector<8xf32>
    %83 = vector.multi_reduction <add>, %82, %cst_30 [1] : vector<8x8xf32> to vector<8xf32>
    %84 = vector.shape_cast %83 : vector<8xf32> to vector<8x1xf32>
    %85 = math.sqrt %84 : vector<8x1xf32>
    %cst_31 = arith.constant 9.99999997E-7 : f32
    %86 = vector.broadcast %cst_31 : f32 to vector<8x1xf32>
    %87 = arith.addf %86, %85 : vector<8x1xf32>
    %88 = vector.broadcast %87 : vector<8x1xf32> to vector<8x8xf32>
    %89 = arith.divf %81, %88 : vector<8x8xf32>
    %90 = tpu.transpose %89, [1, 0] : vector<8x8xf32> -> vector<8x8xf32>
    %c0_32 = arith.constant 0 : index
    %c0_33 = arith.constant 0 : index
    %c0_34 = arith.constant 0 : index
    %91 = vector.load %arg6[%c0_32, %c0_33, %c0_34] : memref<1x8x8xf32, #tpu.memory_space<vmem>>, vector<1x8x8xf32>
    %92 = vector.shape_cast %91 : vector<1x8x8xf32> to vector<8x8xf32>
    %93 = vector.shape_cast %90 : vector<8x8xf32> to vector<1x8x8xf32>
    tpu.vector_store %arg6[%c0_32, %c0_33, %c0_34], %93 {strides = array<i32>} : memref<1x8x8xf32, #tpu.memory_space<vmem>>, vector<1x8x8xf32>,
    %c0_35 = arith.constant 0 : index
    %c0_36 = arith.constant 0 : index
    %c0_37 = arith.constant 0 : index
    %94 = vector.load %arg7[%c0_35, %c0_36, %c0_37] : memref<1x8x256xf32, #tpu.memory_space<vmem>>, vector<1x8x256xf32>
    %95 = vector.shape_cast %94 : vector<1x8x256xf32> to vector<8x256xf32>
    %96 = vector.shape_cast %73 : vector<8x256xf32> to vector<1x8x256xf32>
    tpu.vector_store %arg7[%c0_35, %c0_36, %c0_37], %96 {strides = array<i32>} : memref<1x8x256xf32, #tpu.memory_space<vmem>>, vector<1x8x256xf32>,
    %cst_38 = arith.constant dense<0.000000e+00> : vector<8x256xf32>
    %97 = tpu.matmul %90, %73, %cst_38 {dimension_numbers = #tpu.dot_dimension_numbers<[1], [0], [0], [1], [0, 0, 1, 1], [], []>} : vector<8x8xf32>, vector<8x256xf32>, vector<8x256xf32> -> vector<8x256xf32>
    %cst_39 = arith.constant 0.000000e+00 : f32
    %98 = vector.broadcast %cst_39 : f32 to vector<8x256xf32>
    %99 = arith.maximumf %97, %98 : vector<8x256xf32>
    %c0_40 = arith.constant 0 : index
    %c0_41 = arith.constant 0 : index
    %100 = vector.load %arg4[%c0_40, %c0_41] : memref<4x8xf32, #tpu.memory_space<vmem>>, vector<4x8xf32>
    %cst_42 = arith.constant dense<0.000000e+00> : vector<4x256xf32>
    %101 = tpu.matmul %100, %99, %cst_42 {dimension_numbers = #tpu.dot_dimension_numbers<[1], [0], [0], [1], [0, 0, 1, 1], [], []>} : vector<4x8xf32>, vector<8x256xf32>, vector<4x256xf32> -> vector<4x256xf32>
    %cst_43 = arith.constant dense<0.000000e+00> : vector<4xf32>
    %102 = vector.multi_reduction <add>, %101, %cst_43 [1] : vector<4x256xf32> to vector<4xf32>
    %103 = vector.shape_cast %102 : vector<4xf32> to vector<4x1xf32>
    %c0_44 = arith.constant 0 : index
    %c0_45 = arith.constant 0 : index
    %c0_46 = arith.constant 0 : index
    %104 = vector.load %arg8[%c0_44, %c0_45, %c0_46] : memref<1x4x2xf32, #tpu.memory_space<vmem>>, vector<1x4x1xf32>
    %105 = vector.shape_cast %104 : vector<1x4x1xf32> to vector<4x1xf32>
    %106 = vector.shape_cast %103 : vector<4x1xf32> to vector<1x4x1xf32>
    tpu.vector_store %arg8[%c0_44, %c0_45, %c0_46], %106 {strides = array<i32>} : memref<1x4x2xf32, #tpu.memory_space<vmem>>, vector<1x4x1xf32>,
    %107 = arith.mulf %101, %101 : vector<4x256xf32>
    %cst_47 = arith.constant dense<0.000000e+00> : vector<4xf32>
    %108 = vector.multi_reduction <add>, %107, %cst_47 [1] : vector<4x256xf32> to vector<4xf32>
    %109 = vector.shape_cast %108 : vector<4xf32> to vector<4x1xf32>
    %c0_48 = arith.constant 0 : index
    %c0_49 = arith.constant 0 : index
    %c1 = arith.constant 1 : index
    %110 = vector.load %arg8[%c0_48, %c0_49, %c1] : memref<1x4x2xf32, #tpu.memory_space<vmem>>, vector<1x4x1xf32>
    %111 = vector.shape_cast %110 : vector<1x4x1xf32> to vector<4x1xf32>
    %112 = vector.shape_cast %109 : vector<4x1xf32> to vector<1x4x1xf32>
    tpu.vector_store %arg8[%c0_48, %c0_49, %c1], %112 {strides = array<i32>} : memref<1x4x2xf32, #tpu.memory_space<vmem>>, vector<1x4x1xf32>,
    return
  }
  func.func @transform_0(%arg0: i32) -> (i32, i32, i32) {
    %c0_i32 = arith.constant 0 : i32
    %c0_i32_0 = arith.constant 0 : i32
    %c0_i32_1 = arith.constant 0 : i32
    return %arg0, %c0_i32, %c0_i32_0 : i32, i32, i32
  }
  func.func @transform_1(%arg0: i32) -> (i32, i32) {
    %c0_i32 = arith.constant 0 : i32
    %c0_i32_0 = arith.constant 0 : i32
    %c0_i32_1 = arith.constant 0 : i32
    return %c0_i32, %c0_i32_0 : i32, i32
  }
  func.func @transform_2(%arg0: i32) -> (i32, i32) {
    %c0_i32 = arith.constant 0 : i32
    %c0_i32_0 = arith.constant 0 : i32
    %c0_i32_1 = arith.constant 0 : i32
    return %c0_i32, %c0_i32_0 : i32, i32
  }
  func.func @transform_3(%arg0: i32) -> (i32, i32) {
    %c0_i32 = arith.constant 0 : i32
    %c0_i32_0 = arith.constant 0 : i32
    %c0_i32_1 = arith.constant 0 : i32
    return %c0_i32, %c0_i32_0 : i32, i32
  }
  func.func @transform_4(%arg0: i32) -> (i32, i32) {
    %c0_i32 = arith.constant 0 : i32
    %c0_i32_0 = arith.constant 0 : i32
    %c0_i32_1 = arith.constant 0 : i32
    return %c0_i32, %c0_i32_0 : i32, i32
  }
  func.func @transform_5(%arg0: i32) -> (i32, i32, i32) {
    %c0_i32 = arith.constant 0 : i32
    %c0_i32_0 = arith.constant 0 : i32
    %c0_i32_1 = arith.constant 0 : i32
    return %arg0, %c0_i32, %c0_i32_0 : i32, i32, i32
  }
  func.func @transform_6(%arg0: i32) -> (i32, i32, i32) {
    %c0_i32 = arith.constant 0 : i32
    %c0_i32_0 = arith.constant 0 : i32
    %c0_i32_1 = arith.constant 0 : i32
    return %arg0, %c0_i32, %c0_i32_0 : i32, i32, i32
  }
  func.func @transform_7(%arg0: i32) -> (i32, i32, i32) {
    %c0_i32 = arith.constant 0 : i32
    %c0_i32_0 = arith.constant 0 : i32
    %c0_i32_1 = arith.constant 0 : i32
    return %arg0, %c0_i32, %c0_i32_0 : i32, i32, i32
  }
}

module attributes {stable_mosaic.version = 11 : i64} {
  func.func @cae_bn_kernel(%arg0: i32, %arg1: i32, %arg2: memref<1x8x8xf32, #tpu.memory_space<vmem>>, %arg3: memref<1x8x256xf32, #tpu.memory_space<vmem>>, %arg4: memref<4x8xf32, #tpu.memory_space<vmem>>, %arg5: memref<4x1xf32, #tpu.memory_space<vmem>>, %arg6: memref<4x1xf32, #tpu.memory_space<vmem>>, %arg7: memref<1x4x256xf32, #tpu.memory_space<vmem>>, %arg8: memref<1x4x256xf32, #tpu.memory_space<vmem>>) attributes {dimension_semantics = [#tpu.dimension_semantics<parallel>, #tpu.dimension_semantics<parallel>], iteration_bounds = array<i64: 2, 1>, scalar_prefetch = 0 : i64, scratch_operands = 0 : i64, tpu.core_type = #tpu.core_type<tc>, window_params = [{transform_indices = @transform_0, window_bounds = array<i64: 1, 8, 8>}, {transform_indices = @transform_1, window_bounds = array<i64: 1, 8, 256>}, {pipeline_mode = #tpu.pipeline_mode<synchronous>, transform_indices = @transform_2, window_bounds = array<i64: 4, 8>}, {pipeline_mode = #tpu.pipeline_mode<synchronous>, transform_indices = @transform_3, window_bounds = array<i64: 4, 1>}, {pipeline_mode = #tpu.pipeline_mode<synchronous>, transform_indices = @transform_4, window_bounds = array<i64: 4, 1>}, {transform_indices = @transform_5, window_bounds = array<i64: 1, 4, 256>}, {transform_indices = @transform_6, window_bounds = array<i64: 1, 4, 256>}]} {
    %c0 = arith.constant 0 : index
    %c0_0 = arith.constant 0 : index
    %c0_1 = arith.constant 0 : index
    %0 = vector.load %arg2[%c0, %c0_0, %c0_1] : memref<1x8x8xf32, #tpu.memory_space<vmem>>, vector<1x8x8xf32>
    %1 = vector.shape_cast %0 : vector<1x8x8xf32> to vector<8x8xf32>
    %c0_2 = arith.constant 0 : index
    %c0_3 = arith.constant 0 : index
    %c0_4 = arith.constant 0 : index
    %2 = vector.load %arg3[%c0_2, %c0_3, %c0_4] : memref<1x8x256xf32, #tpu.memory_space<vmem>>, vector<1x8x256xf32>
    %3 = vector.shape_cast %2 : vector<1x8x256xf32> to vector<8x256xf32>
    %cst = arith.constant dense<0.000000e+00> : vector<8x256xf32>
    %4 = tpu.matmul %1, %3, %cst {dimension_numbers = #tpu.dot_dimension_numbers<[1], [0], [0], [1], [0, 0, 1, 1], [], []>} : vector<8x8xf32>, vector<8x256xf32>, vector<8x256xf32> -> vector<8x256xf32>
    %cst_5 = arith.constant 0.000000e+00 : f32
    %5 = vector.broadcast %cst_5 : f32 to vector<8x256xf32>
    %6 = arith.maximumf %4, %5 : vector<8x256xf32>
    %c0_6 = arith.constant 0 : index
    %c0_7 = arith.constant 0 : index
    %7 = vector.load %arg4[%c0_6, %c0_7] : memref<4x8xf32, #tpu.memory_space<vmem>>, vector<4x8xf32>
    %cst_8 = arith.constant dense<0.000000e+00> : vector<4x256xf32>
    %8 = tpu.matmul %7, %6, %cst_8 {dimension_numbers = #tpu.dot_dimension_numbers<[1], [0], [0], [1], [0, 0, 1, 1], [], []>} : vector<4x8xf32>, vector<8x256xf32>, vector<4x256xf32> -> vector<4x256xf32>
    %c0_9 = arith.constant 0 : index
    %c0_10 = arith.constant 0 : index
    %9 = vector.load %arg5[%c0_9, %c0_10] : memref<4x1xf32, #tpu.memory_space<vmem>>, vector<4x1xf32>
    %10 = vector.broadcast %9 : vector<4x1xf32> to vector<4x256xf32>
    %11 = arith.mulf %8, %10 : vector<4x256xf32>
    %c0_11 = arith.constant 0 : index
    %c0_12 = arith.constant 0 : index
    %12 = vector.load %arg6[%c0_11, %c0_12] : memref<4x1xf32, #tpu.memory_space<vmem>>, vector<4x1xf32>
    %13 = vector.broadcast %12 : vector<4x1xf32> to vector<4x256xf32>
    %14 = arith.addf %11, %13 : vector<4x256xf32>
    %c0_13 = arith.constant 0 : index
    %c0_14 = arith.constant 0 : index
    %c0_15 = arith.constant 0 : index
    %15 = vector.load %arg7[%c0_13, %c0_14, %c0_15] : memref<1x4x256xf32, #tpu.memory_space<vmem>>, vector<1x4x256xf32>
    %16 = vector.shape_cast %15 : vector<1x4x256xf32> to vector<4x256xf32>
    %17 = arith.addf %14, %16 : vector<4x256xf32>
    %cst_16 = arith.constant 0.000000e+00 : f32
    %18 = vector.broadcast %cst_16 : f32 to vector<4x256xf32>
    %19 = arith.maximumf %17, %18 : vector<4x256xf32>
    %c0_17 = arith.constant 0 : index
    %c0_18 = arith.constant 0 : index
    %c0_19 = arith.constant 0 : index
    %20 = vector.load %arg8[%c0_17, %c0_18, %c0_19] : memref<1x4x256xf32, #tpu.memory_space<vmem>>, vector<1x4x256xf32>
    %21 = vector.shape_cast %20 : vector<1x4x256xf32> to vector<4x256xf32>
    %22 = vector.shape_cast %19 : vector<4x256xf32> to vector<1x4x256xf32>
    tpu.vector_store %arg8[%c0_17, %c0_18, %c0_19], %22 {strides = array<i32>} : memref<1x4x256xf32, #tpu.memory_space<vmem>>, vector<1x4x256xf32>,
    return
  }
  func.func @transform_0(%arg0: i32, %arg1: i32) -> (i32, i32, i32) {
    %c0_i32 = arith.constant 0 : i32
    %c0_i32_0 = arith.constant 0 : i32
    %c0_i32_1 = arith.constant 0 : i32
    return %arg0, %c0_i32, %c0_i32_0 : i32, i32, i32
  }
  func.func @transform_1(%arg0: i32, %arg1: i32) -> (i32, i32, i32) {
    %c0_i32 = arith.constant 0 : i32
    %c0_i32_0 = arith.constant 0 : i32
    return %arg0, %c0_i32, %arg1 : i32, i32, i32
  }
  func.func @transform_2(%arg0: i32, %arg1: i32) -> (i32, i32) {
    %c0_i32 = arith.constant 0 : i32
    %c0_i32_0 = arith.constant 0 : i32
    %c0_i32_1 = arith.constant 0 : i32
    return %c0_i32, %c0_i32_0 : i32, i32
  }
  func.func @transform_3(%arg0: i32, %arg1: i32) -> (i32, i32) {
    %c0_i32 = arith.constant 0 : i32
    %c0_i32_0 = arith.constant 0 : i32
    %c0_i32_1 = arith.constant 0 : i32
    return %c0_i32, %c0_i32_0 : i32, i32
  }
  func.func @transform_4(%arg0: i32, %arg1: i32) -> (i32, i32) {
    %c0_i32 = arith.constant 0 : i32
    %c0_i32_0 = arith.constant 0 : i32
    %c0_i32_1 = arith.constant 0 : i32
    return %c0_i32, %c0_i32_0 : i32, i32
  }
  func.func @transform_5(%arg0: i32, %arg1: i32) -> (i32, i32, i32) {
    %c0_i32 = arith.constant 0 : i32
    %c0_i32_0 = arith.constant 0 : i32
    return %arg0, %c0_i32, %arg1 : i32, i32, i32
  }
  func.func @transform_6(%arg0: i32, %arg1: i32) -> (i32, i32, i32) {
    %c0_i32 = arith.constant 0 : i32
    %c0_i32_0 = arith.constant 0 : i32
    return %arg0, %c0_i32, %arg1 : i32, i32, i32
  }
}

</mosaic_0001>

<bundles_post_ra>
// kernel: cae_forward.3
= control target key start
LH: loop header
LB: loop body
LE: loop exit
PB: predicated region body
PF: predicated region fallthrough
CT: control target
= control target key end

     0   :  { %s753_s21 = smov 0   ;;  %s755_s22 = smov 0   ;;  %s808_s0 = inlined_call_operand.vmem [shape: f32[2,8,8], index: 0, kind: input, shape index: {}]   ;;  %s809_s1 = inlined_call_operand.vmem [shape: f32[2,8,256], index: 1, kind: input, shape index: {}]   ;;  %s810_s2 = inlined_call_operand.vmem [shape: f32[4,8], index: 2, kind: input, shape index: {}]   ;;  %s811_s3 = inlined_call_operand.vmem [shape: f32[4,1], index: 3, kind: input, shape index: {}]   ;;  %s812_s4 = inlined_call_operand.vmem [shape: f32[4,1], index: 4, kind: input, shape index: {}]   ;;  %s813_s5 = inlined_call_operand.vmem [shape: f32[2,4,256], index: 5, kind: input, shape index: {}]   ;;  %s814_s6 = inlined_call_operand.vmem [shape: f32[2,4,256], index: 6, kind: output, shape index: {}]  }
   0x1   :  { %s757_s23 = smov 0  }
   0x2 LB: > { %s28_s24 = sadd.s32 1, %s710_s22  ;;  %p649_p0 = scmp.ge.s32.totalorder %s714_s23, 1  ;;  %s714_s23 = sphi %s757_s23, %s16_s23   ;;  %s710_s22 = sphi %s755_s22, %s816_s22   ;;  %s706_s21 = sphi %s753_s21, %s815_s21  }
   0x3   : > { %p30_p1 = scmp.ge.s32.totalorder %s28_s24, 2  ;;  %p259_p2 = scmp.lt.s32.totalorder %s714_s23, 3 }
   0x5   : > { %s818_s24 = smov (%p30_p1, %s28_s24), 0  ;;  %p260_p3 = pnand %p649_p0, %p259_p2 }
   0x6   : > { %p310_p4 = scmp.lt.s32.totalorder (!%p260_p3), %s706_s21, 1 }
   0x7   : > { %263 = sbr.rel (%p260_p3) target bundleno = 423 (0x1a7), region = 44 }
   0xc   : > { %v716_v0 = vmov 0.0   ;;  %s820_s21 = smov (!%p310_p4, %s706_s21), 1  ;;  %vm347_vm0 = vcmask 64512   ;;  %v499_v4 = vld [vmem:[%s811_s3] sm:$0xf]  ;;  %v717_v5 = vmov 0  }
   0xd   : > { %415 = vmatprep.mubr.f32.mxu0 %v716_v0  ;;  %492 = vmatprep.mubr.f32.mxu1 %v716_v0  ;;  %s771_s25 = sshll.u32 %s820_s21, 3  ;;  %s661_s26 = sshll.u32 %s820_s21, 4  ;;  %v507_v6 = vld [vmem:[%s812_s4] sm:$0xf] }
   0xe   : > { %s322_s29 = scalar_lea.vmem %s809_s1, %s661_s26  ;;  %s313_s8 = scalar_lea.vmem %s808_s0, %s771_s25  ;;  %690 = vset.pattern.permute.xlu0 %v717_v5  ;;  %v424_v11 = vld [vmem:[%s810_s2] sm:$0xf] }
   0xf   : > { %v346_v1 = vld [vmem:[%s322_s29 + $0x8] sm:$0xff]  ;;  %v345_v2 = vld [vmem:[%s322_s29] sm:$0xff]  ;;  %502 = vperm.xlu0 %690, %v499_v4   ;;  %s332_s17 = scalar_lea.vmem %s813_s5, %s771_s25  ;;  %s342_s20 = scalar_lea.vmem %s814_s6, %s771_s25 }
  0x10   : > { %381 = vmatprep.subr.mxu0 %v346_v1  ;;  %v344_v3 = vld [vmem:[%s313_s8] sm:$0xff] }
  0x11   : > { %382 = vmatpush1.msra.mxu0 %v345_v2  ;;  %v515_v14 = vld [vmem:[%s332_s17] sm:$0xff] }
  0x12   : > { %657 = vmatmul.mubr.msk.f32.vlgmr.msra.gmra.mxu0 %vm347_vm0, %v344_v3  ;;  %v517_v20 = vcombine.high %v515_v14, %v515_v14 }
  0x13   : > { %510 = vperm.xlu0 %690, %v507_v6  }
  0x8a   : > { %v503_v12 = vpop.permute.xlu0 %502 }
  0x8e   : > { %v511_v16 = vpop.permute.xlu0 %510 }
  0xd2   : > { %v417_v7 = vpop.f32.mrf.mxu0 }
  0xd3   : > { %v422_v10 = vmax.f32 %v417_v7, 0.0 }
  0xd4   : > { %v419_v8 = vpop.f32.mrf.mxu0 }
  0xd5   : > { %v423_v9 = vmax.f32 %v419_v8, 0.0 }
  0xd7   : > { %458 = vmatprep.subr.mxu1 %v423_v9 }
  0xd8   : > { %459 = vmatpush1.msra.mxu1 %v422_v10 }
  0xd9   : > { %658 = vmatmul.mubr.msk.f32.vlgmr.msra.gmra.mxu1 %vm347_vm0, %v424_v11 }
 0x199   : > { %v494_v13 = vpop.f32.mrf.mxu1 }
 0x19a   : > { %v505_v15 = vmul.f32 %v503_v12, %v494_v13 }
 0x19b   : > { %v496_v17 = vpop.f32.mrf.mxu1 }
 0x19c   : > { %v513_v18 = vadd.f32 %v511_v16, %v505_v15  ;;  %v506_v19 = vmul.f32 %v503_v12, %v496_v17 }
 0x19e   : > { %v519_v21 = vadd.f32 %v515_v14, %v513_v18  ;;  %v514_v22 = vadd.f32 %v511_v16, %v506_v19 }
 0x1a0   : > { %v520_v23 = vadd.f32 %v517_v20, %v514_v22  ;;  %v521_v24 = vmax.f32 %v519_v21, 0.0 }
 0x1a2   : > { %v522_v25 = vmax.f32 %v520_v23, 0.0 }
 0x1a4   : > { %v525_v26 = vcombine.low %v521_v24, %v522_v25 }
 0x1a6   : > { %527 = vst [vmem:[%s342_s20] sm:$0xff] %v525_v26 }
 0x1a7 PF: > { %s16_s23 = sadd.s32 1, %s714_s23   ;;  %s815_s21 = smov %s710_s22 }
 0x1a8   : > { %p13_p5 = scmp.ge.s32.totalorder %s16_s23, 4   ;;  %s816_s22 = smov %s818_s24 }
 0x1aa   :  { %15 = sbr.rel (!%p13_p5) target bundleno = 2 (0x2), region = 80 }

// kernel: cae_forward.2
= control target key start
LH: loop header
LB: loop body
LE: loop exit
PB: predicated region body
PF: predicated region fallthrough
CT: control target
= control target key end

     0   :  { %s1426_s24 = smov 0   ;;  %s1502_s0 = inlined_call_operand.vmem [shape: f32[2,8,256], index: 0, kind: input, shape index: {}]   ;;  %s1503_s1 = inlined_call_operand.vmem [shape: f32[8,8], index: 1, kind: input, shape index: {}]   ;;  %s1504_s2 = inlined_call_operand.vmem [shape: f32[8,1], index: 2, kind: input, shape index: {}]   ;;  %s1505_s3 = inlined_call_operand.vmem [shape: f32[4,8], index: 3, kind: input, shape index: {}]   ;;  %s1506_s4 = inlined_call_operand.vmem [shape: f32[8,8], index: 4, kind: input, shape index: {}]   ;;  %s1507_s5 = inlined_call_operand.vmem [shape: f32[2,8,8], index: 5, kind: output, shape index: {0}]   ;;  %s1508_s6 = inlined_call_operand.vmem [shape: f32[2,8,256], index: 6, kind: output, shape index: {1}]   ;;  %s1509_s7 = inlined_call_operand.vmem [shape: f32[2,4,2], index: 7, kind: output, shape index: {2}]  }
   0x1 LB: > { %s1302_s25 = sadd.s32 4294967295, %s1382_s24   ;;  %p1306_p0 = scmp.ge.s32.totalorder %s1382_s24, 1  ;;  %s1382_s24 = sphi %s1426_s24, %s18_s24  }
   0x2   : > { %p242_p1 = scmp.lt.s32.totalorder %s1382_s24, 3 }
   0x4   : > { %p243_p2 = pnand %p1306_p0, %p242_p1 }
   0x5   : > { %p282_p3 = scmp.lt.s32.totalorder (!%p243_p2), %s1302_s25, 1 }
   0x6   : > { %246 = sbr.rel (%p243_p2) target bundleno = 3227 (0xc9b), region = 40 }
   0xb   : > { %v303_v0 = vld [vmem:[%s1504_s2] sm:$0xff]  ;;  %v1384_v1 = vmov 0.0   ;;  %v1385_v2 = vmov 0   ;;  %s1511_s25 = smov (!%p282_p3, %s1302_s25), 1  ;;  %vm309_vm0 = vcmask 64512   ;;  %vm1168_vm7 = vcmask 1043456  }
   0xc   : > { %377 = vmatprep.mubr.f32.mxu0 %v1384_v1  ;;  %1333 = vset.pattern.permute.xlu0 %v1385_v2  ;;  %s1321_s28 = sshll.u32 %s1511_s25, 4  ;;  %v300_v5 = vld [vmem:[%s1503_s1] sm:$0xff]  ;;  %s1309_s16 = sshll.u32 %s1511_s25, 3  ;;  %vm1174_vm8 = vcmask 3072   ;;  %vm1183_vm9 = vcmask 11272  }
   0xd   : > { %306 = vperm.xlu0 %1333, %v303_v0   ;;  %452 = vmatprep.mubr.f32.mxu1 %v1384_v1  ;;  %s286_s8 = scalar_lea.vmem %s1502_s0, %s1321_s28  ;;  %v384_v11 = vld [vmem:[%s1506_s4] sm:$0xff]  ;;  %s295_s15 = scalar_lea.vmem %s1508_s6, %s1321_s28 }
   0xe   : > { %v302_v3 = vld [vmem:[%s286_s8 + $0x8] sm:$0xff]  ;;  %v301_v4 = vld [vmem:[%s286_s8] sm:$0xff]  ;;  %s290_s19 = scalar_lea.vmem %s1507_s5, %s1309_s16  ;;  %s1312_s22 = sshll.u32 %s1511_s25, 2 }
   0xf   : > { %343 = vmatprep.subr.mxu0 %v302_v3  ;;  %s299_s27 = scalar_lea.vmem %s1509_s7, %s1312_s22 }
  0x10   : > { %344 = vmatpush1.msra.mxu0 %v301_v4 }
  0x11   : > { %1313 = vmatmul.mubr.msk.f32.vlgmr.msra.gmra.mxu0 %vm309_vm0, %v300_v5 }
  0x88   : > { %v307_v7 = vpop.permute.xlu0 %306 }
  0xd1   : > { %v379_v6 = vpop.f32.mrf.mxu0 }
  0xd2   : > { %v1453_v10 = vadd.f32 %v379_v6, %v307_v7 }
  0xd3   : > { %v381_v8 = vpop.f32.mrf.mxu0 }
  0xd4   : > { %v1451_v9 = vadd.f32 %v381_v8, %v307_v7 }
  0xd6   : > { %418 = vmatprep.subr.mxu1 %v1451_v9  ;;  %530 = vmatprep.subr.mxu0 %v1451_v9 }
  0xd7   : > { %419 = vmatpush1.msra.mxu1 %v1453_v10  ;;  %531 = vmatpush1.xpose.msra.mxu0 %v1453_v10 }
  0xd8   : > { %1314 = vmatmul.mubr.msk.f32.vlgmr.msra.gmra.mxu1 %vm309_vm0, %v384_v11  ;;  %617 = vmatprep.subr.mxu1 %v1451_v9 }
  0xd9   : > { %729 = vmatprep.subr.mxu0 %v1451_v9  ;;  %618 = vmatpush1.msra.mxu1 %v1453_v10 }
  0xda   : > { %816 = vmatprep.subr.mxu1 %v1451_v9  ;;  %651 = vmatprep.mubr.f32.mxu1 %v1384_v1 }
 0x198   : > { %v454_v12 = vpop.f32.mrf.mxu1 }
 0x199   : > { %v459_v13 = vrot.slane %v454_v12, 4 }
 0x19a   : > { %v456_v14 = vpop.f32.mrf.mxu1 }
 0x19b   : > { %v460_v15 = vmax.f32 %v454_v12, %v459_v13  ;;  %v465_v16 = vrot.slane %v456_v14, 4 }
 0x19d   : > { %v461_v17 = vrot.slane %v460_v15, 2  ;;  %v466_v18 = vmax.f32 %v456_v14, %v465_v16 }
 0x19f   : > { %v462_v19 = vmax.f32 %v460_v15, %v461_v17  ;;  %v467_v20 = vrot.slane %v466_v18, 2 }
 0x1a1   : > { %v463_v21 = vrot.slane %v462_v19, 1  ;;  %v468_v22 = vmax.f32 %v466_v18, %v467_v20 }
 0x1a3   : > { %v464_v23 = vmax.f32 %v462_v19, %v463_v21  ;;  %v469_v24 = vrot.slane %v468_v22, 1 }
 0x1a5   : > { %v471_v25 = vsub.f32 %v454_v12, %v464_v23  ;;  %v470_v26 = vmax.f32 %v468_v22, %v469_v24 }
 0x1a7   : > { %v473_v27 = vmul.f32 1.442695, %v471_v25  ;;  %v472_v28 = vsub.f32 %v456_v14, %v470_v26 }
 0x1a9   : > { %1334 = vpow2.f32 %v473_v27  ;;  %v475_v29 = vmul.f32 1.442695, %v472_v28 }
 0x1ab   : > { %1336 = vpow2.f32 %v475_v29 }
 0x1b6   : > { %v1335_v30 = vpop.eup %1334 }
 0x1b7   : > { %v477_v31 = vrot.slane %v1335_v30, 4 }
 0x1b8   : > { %v1337_v32 = vpop.eup %1336 }
 0x1b9   : > { %v478_v33 = vadd.f32 %v1335_v30, %v477_v31  ;;  %v483_v34 = vrot.slane %v1337_v32, 4 }
 0x1bb   : > { %v479_v35 = vrot.slane %v478_v33, 2  ;;  %v484_v36 = vadd.f32 %v1337_v32, %v483_v34 }
 0x1bd   : > { %v480_v37 = vadd.f32 %v479_v35, %v478_v33  ;;  %v485_v38 = vrot.slane %v484_v36, 2 }
 0x1bf   : > { %v481_v39 = vrot.slane %v480_v37, 1  ;;  %v486_v40 = vadd.f32 %v485_v38, %v484_v36 }
 0x1c1   : > { %v482_v41 = vadd.f32 %v481_v39, %v480_v37  ;;  %v487_v42 = vrot.slane %v486_v40, 1 }
 0x1c3   : > { %v488_v43 = vadd.f32 %v487_v42, %v486_v40  ;;  %1338 = vrcp.f32 %v482_v41 }
 0x1c5   : > { %1340 = vrcp.f32 %v488_v43 }
 0x1d0   : > { %v1339_v44 = vpop.eup %1338 }
 0x1d1   : > { %v491_v46 = vmul.f32 %v1339_v44, %v1335_v30 }
 0x1d2   : > { %v1341_v45 = vpop.eup %1340 }
 0x1d3   : > { %v492_v47 = vmul.f32 %v1341_v45, %v1337_v32 }
 0x1d5   : > { %v493_v48 = vadd.f32 %v492_v47, %v491_v46 }
 0x1d7   : > { %494 = vadd.xlane.f32.xlu0 %v493_v48 }
 0x260   : > { %v495_v49 = vpop.xlane.xlu0 %494 }
 0x261   : > { %v496_v50 = vadd.f32 1e-06, %v495_v49 }
 0x263   : > { %1342 = vrcp.f32 %v496_v50 }
 0x270   : > { %v1343_v51 = vpop.eup %1342 }
 0x271   : > { %v499_v52 = vmul.f32 %v1343_v51, %v492_v47  ;;  %v498_v53 = vmul.f32 %v1343_v51, %v491_v46 }
 0x273   : > { %564 = vmatprep.mubr.f32.mxu0 %v499_v52 }
 0x274   : > { %565 = vmatmul.mubr.f32.vlgmr.msra.gmra.mxu0 %v498_v53 }
 0x275   : > { %730 = vmatpush1.xpose.msra.mxu0 %v1453_v10 }
 0x276   : > { %928 = vmatprep.subr.mxu0 %v1451_v9 }
 0x334   : > { %v566_v54 = vpop.f32.mrf.mxu0 }
 0x335   : > { %v570_v55 = vmul.f32 %v566_v54, %v566_v54 }
 0x336   : > { %v568_v56 = vpop.f32.mrf.mxu0 }
 0x337   : > { %v571_v57 = vsel %vm309_vm0, %v570_v55, 0.0 }
 0x338   : > { %572 = vadd.xlane.f32.xlu1 %v571_v57 }
 0x3c1   : > { %v573_v58 = vpop.xlane.xlu1 %572 }
 0x3c2   : > { %1344 = vrsqrt.f32 %v573_v58  ;;  %vm576_vm1 = vcmp.eq.f32.partialorder %v573_v58, inf  ;;  %v579_v61 = vand.u32 2147483648, %v573_v58  ;;  %vm578_vm2 = vcmp.eq.f32.partialorder %v573_v58, 0.0 }
 0x3cf   : > { %v1345_v59 = vpop.eup %1344 }
 0x3d0   : > { %v575_v60 = vmul.f32 %v1345_v59, %v573_v58 }
 0x3d2   : > { %v577_v62 = vsel %vm576_vm1, %v573_v58, %v575_v60 }
 0x3d3   : > { %v580_v63 = vsel %vm578_vm2, %v579_v61, %v577_v62 }
 0x3d4   : > { %v581_v0 = vadd.f32 1e-06, %v580_v63 }
 0x3d6   : > { %1346 = vrcp.f32 %v581_v0 }
 0x3e3   : > { %v1347_v2 = vpop.eup %1346 }
 0x3e4   : > { %v583_v3 = vmul.f32 %v1347_v2, %v566_v54 }
 0x3e6   : > { %1315 = vmatmul.mubr.msk.f32.vlgmr.msra.gmra.mxu1 %vm309_vm0, %v583_v3 }
 0x3e7   : > { %817 = vmatpush1.msra.mxu1 %v1453_v10  ;;  %850 = vmatprep.mubr.f32.mxu1 %v1384_v1 }
 0x4a6   : > { %v653_v4 = vpop.f32.mrf.mxu1 }
 0x4a7   : > { %v658_v5 = vrot.slane %v653_v4, 4 }
 0x4a8   : > { %v655_v6 = vpop.f32.mrf.mxu1 }
 0x4a9   : > { %v659_v7 = vmax.f32 %v653_v4, %v658_v5  ;;  %v664_v8 = vrot.slane %v655_v6, 4 }
 0x4ab   : > { %v660_v9 = vrot.slane %v659_v7, 2  ;;  %v665_v11 = vmax.f32 %v655_v6, %v664_v8 }
 0x4ad   : > { %v661_v12 = vmax.f32 %v659_v7, %v660_v9  ;;  %v666_v13 = vrot.slane %v665_v11, 2 }
 0x4af   : > { %v662_v14 = vrot.slane %v661_v12, 1  ;;  %v667_v15 = vmax.f32 %v665_v11, %v666_v13 }
 0x4b1   : > { %v663_v16 = vmax.f32 %v661_v12, %v662_v14  ;;  %v668_v17 = vrot.slane %v667_v15, 1 }
 0x4b3   : > { %v670_v18 = vsub.f32 %v653_v4, %v663_v16  ;;  %v669_v19 = vmax.f32 %v667_v15, %v668_v17 }
 0x4b5   : > { %v672_v20 = vmul.f32 1.442695, %v670_v18  ;;  %v671_v21 = vsub.f32 %v655_v6, %v669_v19 }
 0x4b7   : > { %1348 = vpow2.f32 %v672_v20  ;;  %v674_v22 = vmul.f32 1.442695, %v671_v21 }
 0x4b9   : > { %1350 = vpow2.f32 %v674_v22 }
 0x4c4   : > { %v1349_v23 = vpop.eup %1348 }
 0x4c5   : > { %v676_v24 = vrot.slane %v1349_v23, 4 }
 0x4c6   : > { %v1351_v25 = vpop.eup %1350 }
 0x4c7   : > { %v677_v26 = vadd.f32 %v1349_v23, %v676_v24  ;;  %v682_v27 = vrot.slane %v1351_v25, 4 }
 0x4c9   : > { %v678_v28 = vrot.slane %v677_v26, 2  ;;  %v683_v29 = vadd.f32 %v1351_v25, %v682_v27 }
 0x4cb   : > { %v679_v30 = vadd.f32 %v678_v28, %v677_v26  ;;  %v684_v31 = vrot.slane %v683_v29, 2 }
 0x4cd   : > { %v680_v32 = vrot.slane %v679_v30, 1  ;;  %v685_v33 = vadd.f32 %v684_v31, %v683_v29 }
 0x4cf   : > { %v681_v34 = vadd.f32 %v680_v32, %v679_v30  ;;  %v686_v35 = vrot.slane %v685_v33, 1 }
 0x4d1   : > { %v687_v36 = vadd.f32 %v686_v35, %v685_v33  ;;  %1352 = vrcp.f32 %v681_v34 }
 0x4d3   : > { %1354 = vrcp.f32 %v687_v36 }
 0x4de   : > { %v1353_v37 = vpop.eup %1352 }
 0x4df   : > { %v690_v39 = vmul.f32 %v1353_v37, %v1349_v23 }
 0x4e0   : > { %v1355_v38 = vpop.eup %1354 }
 0x4e1   : > { %v691_v40 = vmul.f32 %v1355_v38, %v1351_v25 }
 0x4e3   : > { %v692_v41 = vadd.f32 %v691_v40, %v690_v39 }
 0x4e5   : > { %693 = vadd.xlane.f32.xlu1 %v692_v41 }
 0x56e   : > { %v694_v42 = vpop.xlane.xlu1 %693 }
 0x56f   : > { %v695_v43 = vadd.f32 1e-06, %v694_v42 }
 0x571   : > { %1356 = vrcp.f32 %v695_v43 }
 0x57e   : > { %v1357_v44 = vpop.eup %1356 }
 0x57f   : > { %v698_v45 = vmul.f32 %v1357_v44, %v691_v40  ;;  %v697_v46 = vmul.f32 %v1357_v44, %v690_v39 }
 0x581   : > { %763 = vmatprep.mubr.f32.mxu0 %v698_v45 }
 0x582   : > { %764 = vmatmul.mubr.f32.vlgmr.msra.gmra.mxu0 %v697_v46 }
 0x583   : > { %929 = vmatpush1.xpose.msra.mxu0 %v1453_v10 }
 0x642   : > { %v765_v47 = vpop.f32.mrf.mxu0 }
 0x643   : > { %v769_v48 = vmul.f32 %v765_v47, %v765_v47 }
 0x644   : > { %v767_v49 = vpop.f32.mrf.mxu0 }
 0x645   : > { %v770_v50 = vsel %vm309_vm0, %v769_v48, 0.0 }
 0x646   : > { %771 = vadd.xlane.f32.xlu1 %v770_v50 }
 0x6cf   : > { %v772_v51 = vpop.xlane.xlu1 %771 }
 0x6d0   : > { %1358 = vrsqrt.f32 %v772_v51  ;;  %vm775_vm3 = vcmp.eq.f32.partialorder %v772_v51, inf  ;;  %v778_v54 = vand.u32 2147483648, %v772_v51  ;;  %vm777_vm4 = vcmp.eq.f32.partialorder %v772_v51, 0.0 }
 0x6dd   : > { %v1359_v52 = vpop.eup %1358 }
 0x6de   : > { %v774_v53 = vmul.f32 %v1359_v52, %v772_v51 }
 0x6e0   : > { %v776_v55 = vsel %vm775_vm3, %v772_v51, %v774_v53 }
 0x6e1   : > { %v779_v56 = vsel %vm777_vm4, %v778_v54, %v776_v55 }
 0x6e2   : > { %v780_v57 = vadd.f32 1e-06, %v779_v56  ;;  %v1093_v56 = vld [vmem:[%s1505_s3] sm:$0xf] }
 0x6e4   : > { %1360 = vrcp.f32 %v780_v57 }
 0x6f1   : > { %v1361_v58 = vpop.eup %1360 }
 0x6f2   : > { %v782_v59 = vmul.f32 %v1361_v58, %v765_v47 }
 0x6f4   : > { %1316 = vmatmul.mubr.msk.f32.vlgmr.msra.gmra.mxu1 %vm309_vm0, %v782_v59 }
 0x6f5   : > { %1084 = vmatprep.mubr.f32.mxu1 %v1384_v1 }
 0x7b4   : > { %v852_v10 = vpop.f32.mrf.mxu1 }
 0x7b5   : > { %v857_v60 = vrot.slane %v852_v10, 4 }
 0x7b6   : > { %v854_v61 = vpop.f32.mrf.mxu1 }
 0x7b7   : > { %v858_v62 = vmax.f32 %v852_v10, %v857_v60  ;;  %v863_v63 = vrot.slane %v854_v61, 4 }
 0x7b9   : > { %v859_v0 = vrot.slane %v858_v62, 2  ;;  %v864_v2 = vmax.f32 %v854_v61, %v863_v63 }
 0x7bb   : > { %v860_v3 = vmax.f32 %v858_v62, %v859_v0  ;;  %v865_v4 = vrot.slane %v864_v2, 2 }
 0x7bd   : > { %v861_v5 = vrot.slane %v860_v3, 1  ;;  %v866_v6 = vmax.f32 %v864_v2, %v865_v4 }
 0x7bf   : > { %v862_v7 = vmax.f32 %v860_v3, %v861_v5  ;;  %v867_v8 = vrot.slane %v866_v6, 1 }
 0x7c1   : > { %v869_v9 = vsub.f32 %v852_v10, %v862_v7  ;;  %v868_v11 = vmax.f32 %v866_v6, %v867_v8 }
 0x7c3   : > { %v871_v12 = vmul.f32 1.442695, %v869_v9  ;;  %v870_v13 = vsub.f32 %v854_v61, %v868_v11 }
 0x7c5   : > { %1362 = vpow2.f32 %v871_v12  ;;  %v873_v14 = vmul.f32 1.442695, %v870_v13 }
 0x7c7   : > { %1364 = vpow2.f32 %v873_v14 }
 0x7d2   : > { %v1363_v15 = vpop.eup %1362 }
 0x7d3   : > { %v875_v16 = vrot.slane %v1363_v15, 4 }
 0x7d4   : > { %v1365_v17 = vpop.eup %1364 }
 0x7d5   : > { %v881_v18 = vrot.slane %v1365_v17, 4  ;;  %v876_v19 = vadd.f32 %v1363_v15, %v875_v16 }
 0x7d7   : > { %v882_v20 = vadd.f32 %v1365_v17, %v881_v18  ;;  %v877_v21 = vrot.slane %v876_v19, 2 }
 0x7d9   : > { %v883_v22 = vrot.slane %v882_v20, 2  ;;  %v878_v23 = vadd.f32 %v877_v21, %v876_v19 }
 0x7db   : > { %v884_v24 = vadd.f32 %v883_v22, %v882_v20  ;;  %v879_v25 = vrot.slane %v878_v23, 1 }
 0x7dd   : > { %v885_v26 = vrot.slane %v884_v24, 1  ;;  %v880_v27 = vadd.f32 %v879_v25, %v878_v23 }
 0x7df   : > { %v886_v28 = vadd.f32 %v885_v26, %v884_v24  ;;  %1366 = vrcp.f32 %v880_v27 }
 0x7e1   : > { %1368 = vrcp.f32 %v886_v28 }
 0x7ec   : > { %v1367_v29 = vpop.eup %1366 }
 0x7ed   : > { %v889_v30 = vmul.f32 %v1367_v29, %v1363_v15 }
 0x7ee   : > { %v1369_v31 = vpop.eup %1368 }
 0x7ef   : > { %v890_v32 = vmul.f32 %v1369_v31, %v1365_v17  ;;  %1015 = vst [vmem:[%s295_s15] sm:$0xff] %v889_v30 }
 0x7f1   : > { %1016 = vst [vmem:[%s295_s15 + $0x8] sm:$0xff] %v890_v32  ;;  %1050 = vmatprep.subr.mxu1 %v890_v32  ;;  %v891_v33 = vadd.f32 %v890_v32, %v889_v30 }
 0x7f2   : > { %1051 = vmatpush1.msra.mxu1 %v889_v30 }
 0x7f3   : > { %892 = vadd.xlane.f32.xlu1 %v891_v33 }
 0x87c   : > { %v893_v34 = vpop.xlane.xlu1 %892 }
 0x87d   : > { %v894_v35 = vadd.f32 1e-06, %v893_v34 }
 0x87f   : > { %1370 = vrcp.f32 %v894_v35 }
 0x88c   : > { %v1371_v36 = vpop.eup %1370 }
 0x88d   : > { %v897_v37 = vmul.f32 %v1371_v36, %v890_v32  ;;  %v896_v38 = vmul.f32 %v1371_v36, %v889_v30 }
 0x88f   : > { %962 = vmatprep.mubr.f32.mxu0 %v897_v37 }
 0x890   : > { %963 = vmatmul.mubr.f32.vlgmr.msra.gmra.mxu0 %v896_v38 }
 0x891   : > { %1161 = vmatprep.mubr.f32.mxu0 %v1384_v1 }
 0x950   : > { %v964_v39 = vpop.f32.mrf.mxu0 }
 0x951   : > { %v968_v40 = vmul.f32 %v964_v39, %v964_v39 }
 0x952   : > { %v966_v41 = vpop.f32.mrf.mxu0 }
 0x953   : > { %v969_v42 = vsel %vm309_vm0, %v968_v40, 0.0 }
 0x954   : > { %970 = vadd.xlane.f32.xlu1 %v969_v42 }
 0x9dd   : > { %v971_v43 = vpop.xlane.xlu1 %970 }
 0x9de   : > { %1372 = vrsqrt.f32 %v971_v43  ;;  %vm974_vm5 = vcmp.eq.f32.partialorder %v971_v43, inf  ;;  %v977_v46 = vand.u32 2147483648, %v971_v43  ;;  %vm976_vm6 = vcmp.eq.f32.partialorder %v971_v43, 0.0 }
 0x9eb   : > { %v1373_v44 = vpop.eup %1372 }
 0x9ec   : > { %v973_v45 = vmul.f32 %v1373_v44, %v971_v43 }
 0x9ee   : > { %v975_v47 = vsel %vm974_vm5, %v971_v43, %v973_v45 }
 0x9ef   : > { %v978_v48 = vsel %vm976_vm6, %v977_v46, %v975_v47 }
 0x9f0   : > { %v979_v49 = vadd.f32 1e-06, %v978_v48 }
 0x9f2   : > { %1374 = vrcp.f32 %v979_v49 }
 0x9ff   : > { %v1375_v50 = vpop.eup %1374 }
 0xa00   : > { %v981_v1 = vmul.f32 %v1375_v50, %v964_v39 }
 0xa02   : > { %982 = vxpose.xlu1.b32.start.end [1/1] (short) (narrow) %v981_v1, 8 }
 0xa7e   : > { %v998_v51 = vpop.trf.xlu1 }
 0xa7f   : > { %1014 = vst.msk [vmem:[%s290_s19] sm:$0xff] %vm309_vm0, %v998_v51  ;;  %1317 = vmatmul.mubr.msk.f32.vlgmr.msra.gmra.mxu1 %vm309_vm0, %v998_v51 }
 0xb3f   : > { %v1086_v52 = vpop.f32.mrf.mxu1 }
 0xb40   : > { %v1091_v55 = vmax.f32 %v1086_v52, 0.0 }
 0xb41   : > { %v1088_v53 = vpop.f32.mrf.mxu1 }
 0xb42   : > { %v1092_v54 = vmax.f32 %v1088_v53, 0.0 }
 0xb44   : > { %1127 = vmatprep.subr.mxu0 %v1092_v54 }
 0xb45   : > { %1128 = vmatpush1.msra.mxu0 %v1091_v55 }
 0xb46   : > { %1318 = vmatmul.mubr.msk.f32.vlgmr.msra.gmra.mxu0 %vm309_vm0, %v1093_v56 }
 0xc06   : > { %v1163_v57 = vpop.f32.mrf.mxu0 }
 0xc07   : > { %v1169_v59 = vsel %vm1168_vm7, %v1163_v57, 0.0  ;;  %v1176_v10 = vmul.f32 %v1163_v57, %v1163_v57 }
 0xc08   : > { %v1165_v58 = vpop.f32.mrf.mxu0 }
 0xc09   : > { %v1170_v60 = vsel %vm1168_vm7, %v1165_v58, 0.0  ;;  %v1177_v61 = vmul.f32 %v1165_v58, %v1165_v58  ;;  %v1178_v0 = vsel %vm1168_vm7, %v1176_v10, 0.0 }
 0xc0a   : > { %v1171_v62 = vadd.f32 %v1170_v60, %v1169_v59 }
 0xc0b   : > { %v1179_v63 = vsel %vm1168_vm7, %v1177_v61, 0.0 }
 0xc0c   : > { %1172 = vadd.xlane.f32.xlu0 %v1171_v62  ;;  %v1180_v2 = vadd.f32 %v1179_v63, %v1178_v0 }
 0xc10   : > { %1181 = vadd.xlane.f32.xlu0 %v1180_v2 }
 0xc95   : > { %v1173_v3 = vpop.xlane.xlu0 %1172 }
 0xc96   : > { %1175 = vst.msk [vmem:[%s299_s27] sm:$0xf] %vm1174_vm8, %v1173_v3 }
 0xc99   : > { %v1182_v4 = vpop.xlane.xlu0 %1181 }
 0xc9a   : > { %1184 = vst.msk [vmem:[%s299_s27] sm:$0xf] %vm1183_vm9, %v1182_v4 }
 0xc9b PF: > { %s18_s24 = sadd.s32 1, %s1382_s24  }
 0xc9c   : > { %p15_p4 = scmp.ge.s32.totalorder %s18_s24, 4  }
 0xc9e   :  { %17 = sbr.rel (!%p15_p4) target bundleno = 1 (0x1), region = 94 }

</bundles_post_ra>
